<compile_context>
chip_gen: v7x
topology: tpu7x:2x2x1
jax: 0.10.0
libtpu: 0.0.40
codegen_flags: <defaults>
</compile_context>

<pallas_src>
import math

import jax
import jax.numpy as jnp
from jax.experimental import pallas as pl
from jax.experimental.pallas import tpu as pltpu

# ----------------------------- configuration --------------------------------
BATCH        = 8
C_IN         = 4
H = W        = 16
FEATURE_SIZE = 32      # stands in for backbone 'bn2.weight' size
EMBED        = 512     # hardcoded in MyModel (Linear(feature_size, 512))
CLASSES      = 128     # classes_number (small for the demo; lane-aligned)
S            = 32.0
M            = 0.5
BN_EPS       = 1e-5

COS_M     = math.cos(M)
SIN_M     = math.sin(M)
MM        = SIN_M * M
THRESHOLD = math.cos(math.pi - M)


# ------------------------------ Pallas kernel --------------------------------
def fused_head_arcface_kernel(feat_ref, wf_ref, bf_ref, kn_ref, label_ref,
                              out_ref):
    """Fused head:
         [BN1(eval) -> Dropout(identity) -> Linear -> BN2(eval)]  (pre-folded
         into wf/bf outside the kernel)
         -> F.normalize(p=2, dim=1)
         -> ArcFace margin logits  (kernel_norm precomputed outside).
       Single launch; the embedding stays resident in VMEM."""
    x = feat_ref[...]                                                # (B, F)

    # Folded affine chain == BN1 -> Linear -> BN2 in eval mode (one MXU matmul)
    y = jnp.dot(x, wf_ref[...], preferred_element_type=jnp.float32)  # (B, E)
    y = y + bf_ref[...]

    # F.normalize(p=2, dim=1): y / max(||y||, 1e-12) == y * rsqrt(max(y.y,1e-24))
    sq = jnp.sum(y * y, axis=1, keepdims=True)                       # (B, 1)
    emb = y * jax.lax.rsqrt(jnp.maximum(sq, 1e-24))                  # (B, E)

    # ArcFace: cosine logits against the pre-normalized class weights (MXU)
    cos_theta = jnp.dot(emb, kn_ref[...],
                        preferred_element_type=jnp.float32)          # (B, C)
    cos_theta = jnp.clip(cos_theta, -1.0, 1.0)

    sin_theta = jnp.sqrt(jnp.maximum(1.0 - cos_theta * cos_theta, 0.0))
    cos_theta_m = cos_theta * COS_M - sin_theta * SIN_M
    cos_theta_m = jnp.where(cos_theta - THRESHOLD <= 0.0,
                            cos_theta - MM, cos_theta_m)

    # patch the label column of each row (one-hot select), scale by s
    col_ids = jax.lax.broadcasted_iota(jnp.int32, cos_theta.shape, 1)
    is_label = col_ids == label_ref[...]                             # (B,1) bcast
    out_ref[...] = jnp.where(is_label, cos_theta_m, cos_theta) * S


# ------------------------------ wrappers -------------------------------------
def _vmem_spec():
    return pl.BlockSpec(memory_space=pltpu.MemorySpace.VMEM)


@jax.jit
def fused_forward(features, w_fold, b_fold, kernel_norm, label):
    label2d = label.astype(jnp.int32).reshape(-1, 1)
    args = (features, w_fold, b_fold, kernel_norm, label2d)
    return pl.pallas_call(
        fused_head_arcface_kernel,
        out_shape=jax.ShapeDtypeStruct(
            (features.shape[0], kernel_norm.shape[1]), jnp.float32),
        in_specs=[_vmem_spec() for _ in args],
        out_specs=_vmem_spec(),
    )(*args)


def prepare_inference_params(params):
    """One-time parameter prep (NOT per call):
       - fold eval-mode BN1/BN2 into the Linear weight/bias,
       - precompute the column-normalized ArcFace weight."""
    g1, b1, m1, v1 = params["bn1"]                                   # (1, F) each
    g2, b2, m2, v2 = params["bn2"]                                   # (1, E) each
    w, b = params["lin_w"], params["lin_b"]                          # (F,E), (1,E)

    a1 = g1 * jax.lax.rsqrt(v1 + BN_EPS)                             # (1, F)
    a2 = g2 * jax.lax.rsqrt(v2 + BN_EPS)                             # (1, E)
    # ((x - m1)*a1 + b1) @ W + b, then (. - m2)*a2 + b2  ==  x @ W_f + b_f
    w_fold = (a1.reshape(-1, 1) * w) * a2                            # (F, E)
    b_fold = ((b1 - m1 * a1) @ w + b) * a2 + (b2 - m2 * a2)          # (1, E)

    aw = params["arc_weight"]                                        # (E, C)
    col_norm = jnp.sqrt(jnp.sum(aw * aw, axis=0, keepdims=True))     # (1, C)
    kernel_norm = aw / jnp.maximum(col_norm, 1e-12)                  # l2_norm(axis=0)

    return {"backbone_proj": params["backbone_proj"],
            "w_fold": w_fold, "b_fold": b_fold, "kernel_norm": kernel_norm}


def my_model_forward(x_nchw, label, folded):
    # TODO(synk): timm backbone has no Pallas equivalent; stand-in is
    # global-average-pool over HxW followed by a fixed linear projection.
    pooled = jnp.mean(x_nchw, axis=(2, 3))                           # (B, C_in)
    features = pooled @ folded["backbone_proj"]                      # (B, F)
    return fused_forward(features, folded["w_fold"], folded["b_fold"],
                         folded["kernel_norm"], label)


# --------------------------- pure-JAX reference -------------------------------
def reference_forward(x_nchw, label, params):
    """Unfolded reference (BN -> Linear -> BN -> normalize -> ArcFace)."""
    pooled = jnp.mean(x_nchw, axis=(2, 3))
    x = pooled @ params["backbone_proj"]
    g1, b1, m1, v1 = params["bn1"]
    x = (x - m1) * jax.lax.rsqrt(v1 + BN_EPS) * g1 + b1
    y = x @ params["lin_w"] + params["lin_b"]
    g2, b2, m2, v2 = params["bn2"]
    y = (y - m2) * jax.lax.rsqrt(v2 + BN_EPS) * g2 + b2
    norm = jnp.maximum(jnp.sqrt(jnp.sum(y * y, axis=1, keepdims=True)), 1e-12)
    emb = y / norm
    w = params["arc_weight"]
    kn = w / jnp.sqrt(jnp.sum(w * w, axis=0, keepdims=True))
    cos = jnp.clip(emb @ kn, -1.0, 1.0)
    sin = jnp.sqrt(jnp.maximum(1.0 - cos * cos, 0.0))
    cos_m = cos * COS_M - sin * SIN_M
    cos_m = jnp.where(cos - THRESHOLD <= 0.0, cos - MM, cos_m)
    onehot = jax.nn.one_hot(label, w.shape[1], dtype=bool)
    return jnp.where(onehot, cos_m, cos) * S


# ----------------------------- parameter init --------------------------------
def init_params(key):
    k_proj, k_linw, k_linb, k_arc = jax.random.split(key, 4)

    backbone_proj = jax.random.normal(k_proj, (C_IN, FEATURE_SIZE),
                                      jnp.float32) * 0.1

    def bn_params(n):
        return (jnp.ones((1, n), jnp.float32),    # gamma
                jnp.zeros((1, n), jnp.float32),   # beta
                jnp.zeros((1, n), jnp.float32),   # running_mean
                jnp.ones((1, n), jnp.float32))    # running_var

    # Linear(FEATURE_SIZE, 512): kaiming_normal_ on weight, small bias
    lin_w = (jax.random.normal(k_linw, (FEATURE_SIZE, EMBED), jnp.float32)
             * math.sqrt(2.0 / FEATURE_SIZE))
    bound = 1.0 / math.sqrt(FEATURE_SIZE)
    lin_b = jax.random.uniform(k_linb, (1, EMBED), jnp.float32, -bound, bound)

    # Arcface weight (EMBED, CLASSES): uniform(-1, 1); renorm+mul in the
    # original init only rescales columns, which the forward re-normalizes.
    arc_weight = jax.random.uniform(k_arc, (EMBED, CLASSES), jnp.float32,
                                    -1.0, 1.0)

    return {"backbone_proj": backbone_proj,
            "bn1": bn_params(FEATURE_SIZE),
            "lin_w": lin_w, "lin_b": lin_b,
            "bn2": bn_params(EMBED),
            "arc_weight": arc_weight}


# ---------------------------------- main --------------------------------------
if __name__ == "__main__":
    key = jax.random.PRNGKey(0)
    k_x, k_lab, k_par = jax.random.split(key, 3)

    x = jax.random.normal(k_x, (BATCH, C_IN, H, W), jnp.float32)
    label = jax.random.randint(k_lab, (BATCH,), 0, CLASSES, jnp.int32)
    params = init_params(k_par)

    folded = jax.tree_util.tree_map(jnp.asarray, prepare_inference_params(params))

    out = my_model_forward(x, label, folded)
    out = jax.block_until_ready(out)

    assert out.shape == (BATCH, CLASSES)
    assert bool(jnp.all(jnp.isfinite(out)))

    ref = reference_forward(x, label, params)
    assert bool(jnp.allclose(out, ref, rtol=1e-3, atol=1e-3)), (
        float(jnp.max(jnp.abs(out - ref))))

    print("KERNEL_OK")
</pallas_src>

<mosaic_0001>
module attributes {stable_mosaic.version = 11 : i64} {
  func.func @fused_head_arcface_kernel(%arg0: memref<8x32xf32, #tpu.memory_space<vmem>>, %arg1: memref<32x512xf32, #tpu.memory_space<vmem>>, %arg2: memref<1x512xf32, #tpu.memory_space<vmem>>, %arg3: memref<512x128xf32, #tpu.memory_space<vmem>>, %arg4: memref<8x1xi32, #tpu.memory_space<vmem>>, %arg5: memref<8x128xf32, #tpu.memory_space<vmem>>) attributes {dimension_semantics = [], scalar_prefetch = 0 : i64, scratch_operands = 0 : i64, tpu.core_type = #tpu.core_type<tc>} {
    %c0 = arith.constant 0 : index
    %c0_0 = arith.constant 0 : index
    %0 = vector.load %arg0[%c0, %c0_0] : memref<8x32xf32, #tpu.memory_space<vmem>>, vector<8x32xf32>
    %c0_1 = arith.constant 0 : index
    %c0_2 = arith.constant 0 : index
    %1 = vector.load %arg1[%c0_1, %c0_2] : memref<32x512xf32, #tpu.memory_space<vmem>>, vector<32x512xf32>
    %cst = arith.constant dense<0.000000e+00> : vector<8x512xf32>
    %2 = tpu.matmul %0, %1, %cst {dimension_numbers = #tpu.dot_dimension_numbers<[1], [0], [0], [1], [0, 0, 1, 1], [], []>} : vector<8x32xf32>, vector<32x512xf32>, vector<8x512xf32> -> vector<8x512xf32>
    %c0_3 = arith.constant 0 : index
    %c0_4 = arith.constant 0 : index
    %3 = vector.load %arg2[%c0_3, %c0_4] : memref<1x512xf32, #tpu.memory_space<vmem>>, vector<1x512xf32>
    %4 = vector.broadcast %3 : vector<1x512xf32> to vector<8x512xf32>
    %5 = arith.addf %2, %4 : vector<8x512xf32>
    %6 = arith.mulf %5, %5 : vector<8x512xf32>
    %cst_5 = arith.constant dense<0.000000e+00> : vector<8xf32>
    %7 = vector.multi_reduction <add>, %6, %cst_5 [1] : vector<8x512xf32> to vector<8xf32>
    %8 = vector.shape_cast %7 : vector<8xf32> to vector<8x1xf32>
    %cst_6 = arith.constant 1.000000e-24 : f32
    %9 = vector.broadcast %cst_6 : f32 to vector<8x1xf32>
    %10 = arith.maximumf %8, %9 : vector<8x1xf32>
    %11 = math.rsqrt %10 : vector<8x1xf32>
    %12 = vector.broadcast %11 : vector<8x1xf32> to vector<8x512xf32>
    %13 = arith.mulf %5, %12 : vector<8x512xf32>
    %c0_7 = arith.constant 0 : index
    %c0_8 = arith.constant 0 : index
    %14 = vector.load %arg3[%c0_7, %c0_8] : memref<512x128xf32, #tpu.memory_space<vmem>>, vector<512x128xf32>
    %cst_9 = arith.constant dense<0.000000e+00> : vector<8x128xf32>
    %15 = tpu.matmul %13, %14, %cst_9 {dimension_numbers = #tpu.dot_dimension_numbers<[1], [0], [0], [1], [0, 0, 1, 1], [], []>} : vector<8x512xf32>, vector<512x128xf32>, vector<8x128xf32> -> vector<8x128xf32>
    %cst_10 = arith.constant -1.000000e+00 : f32
    %cst_11 = arith.constant 1.000000e+00 : f32
    %16 = vector.broadcast %cst_10 : f32 to vector<8x128xf32>
    %17 = arith.maximumf %16, %15 : vector<8x128xf32>
    %18 = vector.broadcast %cst_11 : f32 to vector<8x128xf32>
    %19 = arith.minimumf %18, %17 : vector<8x128xf32>
    %20 = arith.mulf %19, %19 : vector<8x128xf32>
    %cst_12 = arith.constant 1.000000e+00 : f32
    %21 = vector.broadcast %cst_12 : f32 to vector<8x128xf32>
    %22 = arith.subf %21, %20 : vector<8x128xf32>
    %cst_13 = arith.constant 0.000000e+00 : f32
    %23 = vector.broadcast %cst_13 : f32 to vector<8x128xf32>
    %24 = arith.maximumf %22, %23 : vector<8x128xf32>
    %25 = math.sqrt %24 : vector<8x128xf32>
    %cst_14 = arith.constant 0.87758255 : f32
    %26 = vector.broadcast %cst_14 : f32 to vector<8x128xf32>
    %27 = arith.mulf %19, %26 : vector<8x128xf32>
    %cst_15 = arith.constant 0.47942555 : f32
    %28 = vector.broadcast %cst_15 : f32 to vector<8x128xf32>
    %29 = arith.mulf %25, %28 : vector<8x128xf32>
    %30 = arith.subf %27, %29 : vector<8x128xf32>
    %cst_16 = arith.constant -0.87758255 : f32
    %31 = vector.broadcast %cst_16 : f32 to vector<8x128xf32>
    %32 = arith.subf %19, %31 : vector<8x128xf32>
    %cst_17 = arith.constant 0.000000e+00 : f32
    %33 = vector.broadcast %cst_17 : f32 to vector<8x128xf32>
    %34 = arith.cmpf ole, %32, %33 : vector<8x128xf32>
    %cst_18 = arith.constant 0.239712775 : f32
    %35 = vector.broadcast %cst_18 : f32 to vector<8x128xf32>
    %36 = arith.subf %19, %35 : vector<8x128xf32>
    %37 = arith.select %34, %36, %30 : vector<8x128xi1>, vector<8x128xf32>
    %38 = tpu.iota {dimensions = array<i32: 1>} : vector<8x128xi32>
    %c0_19 = arith.constant 0 : index
    %c0_20 = arith.constant 0 : index
    %39 = vector.load %arg4[%c0_19, %c0_20] : memref<8x1xi32, #tpu.memory_space<vmem>>, vector<8x1xi32>
    %40 = vector.broadcast %39 : vector<8x1xi32> to vector<8x128xi32>
    %41 = arith.cmpi eq, %38, %40 : vector<8x128xi32>
    %42 = arith.select %41, %37, %19 : vector<8x128xi1>, vector<8x128xf32>
    %cst_21 = arith.constant 3.200000e+01 : f32
    %43 = vector.broadcast %cst_21 : f32 to vector<8x128xf32>
    %44 = arith.mulf %42, %43 : vector<8x128xf32>
    %c0_22 = arith.constant 0 : index
    %c0_23 = arith.constant 0 : index
    %45 = vector.load %arg5[%c0_22, %c0_23] : memref<8x128xf32, #tpu.memory_space<vmem>>, vector<8x128xf32>
    tpu.vector_store %arg5[%c0_22, %c0_23], %44 {strides = array<i32>} : memref<8x128xf32, #tpu.memory_space<vmem>>, vector<8x128xf32>,
    return
  }
}

</mosaic_0001>

<bundles_post_ra>
// kernel: fused_forward.1
= control target key start
LH: loop header
LB: loop body
LE: loop exit
PB: predicated region body
PF: predicated region fallthrough
CT: control target
= control target key end

     0   :  { %10 = vsyncpa [#allocation3], 0  ;;  %s845_s0 = inlined_call_operand.vmem [shape: f32[8,32], index: 0, kind: input, shape index: {}]   ;;  %s846_s1 = inlined_call_operand.hbm [shape: f32[32,512], index: 1, kind: input, shape index: {}]   ;;  %s847_s2 = inlined_call_operand.vmem [shape: f32[1,512], index: 2, kind: input, shape index: {}]   ;;  %s848_s3 = inlined_call_operand.hbm [shape: f32[512,128], index: 3, kind: input, shape index: {}]   ;;  %s849_s4 = inlined_call_operand.vmem [shape: s32[8,1], index: 4, kind: input, shape index: {}]   ;;  %s850_s5 = inlined_call_operand.hbm [shape: f32[8,128], index: 5, kind: output, shape index: {}]  }
   0x1   :  { %11 = vsyncpa [#allocation6], 0 }
   0x2   :  { %12 = vsyncpa [#allocation4], 0  ;;  %s739_s18 = smov [#allocation2]   ;;  %s667_s22 = scalar_lea.hbm %s846_s1, 2048 }
   0x3   :  { %s20_s19 = sshll.u32 %s739_s18, 4  ;;  %p668_p0 = scmp.ne.s32.totalorder %s846_s1, %s667_s22  ;;  %s21_s19 = int_to_ptr.vmem [resolvable:$true] %s20_s19 }
   0x4   :  { %p671_p1 = scmp.lt.u32.totalorder %s667_s22, %s846_s1 }
   0x6   :  { %p673_p2 = pnand %p671_p1, %p668_p0 }
   0x8   :  { %676 = shalt.err (!%p673_p2)
}
   0x9   :  { %s677_s27 = scalar_lea.vmem %s21_s19, 2048  ;;  %p682_p4 = scmp.lt.s32.totalorder %s21_s19, %s21_s19 }
   0xa   :  { %p678_p3 = scmp.ne.s32.totalorder %s21_s19, %s677_s27  ;;  %p683_p5 = scmp.lt.s32.totalorder %s677_s27, %s677_s27 }
   0xc   :  { %p684_p6 = por %p683_p5, %p682_p4 }
   0xe   :  { %p685_p7 = pnand %p684_p6, %p678_p3 }
  0x10   :  { %688 = shalt.err (!%p685_p7)
}
  0x11   :  { %s740_s28 = smov 512   ;;  %s741_s29 = smov 32  }
  0x12   :  { %26 = dma.hbm_to_vmem [thread:$0]  %s846_s1, 2048, %s21_s19, [#allocation3], %s740_s28, %s740_s28, %s741_s29  }
  0x13   :  { %s742_s7 = smov [#allocation5]   ;;  %s689_s11 = scalar_lea.hbm %s848_s3, 8192 }
  0x14   :  { %s34_s8 = sshll.u32 %s742_s7, 4  ;;  %p690_p8 = scmp.ne.s32.totalorder %s848_s3, %s689_s11  ;;  %s35_s8 = int_to_ptr.vmem [resolvable:$true] %s34_s8 }
  0x15   :  { %p693_p9 = scmp.lt.u32.totalorder %s689_s11, %s848_s3 }
  0x17   :  { %p695_p10 = pnand %p693_p9, %p690_p8 }
  0x19   :  { %698 = shalt.err (!%p695_p10)
}
  0x1a   :  { %s699_s16 = scalar_lea.vmem %s35_s8, 8192  ;;  %p704_p12 = scmp.lt.s32.totalorder %s35_s8, %s35_s8 }
  0x1b   :  { %p700_p11 = scmp.ne.s32.totalorder %s35_s8, %s699_s16  ;;  %p705_p13 = scmp.lt.s32.totalorder %s699_s16, %s699_s16 }
  0x1d   :  { %p706_p0 = por %p705_p13, %p704_p12 }
  0x1f   :  { %p707_p1 = pnand %p706_p0, %p700_p11 }
  0x21   :  { %710 = shalt.err (!%p707_p1)
}
  0x22   :  { %s743_s1 = smov 128   ;;  %s744_s17 = smov 8  }
  0x23   :  { %40 = dma.hbm_to_vmem [thread:$0]  %s848_s3, 8192, %s35_s8, [#allocation6], %s743_s1, %s743_s1, %s744_s17  }
  0x24   :  { %733 = dma.done.wait [#allocation3], 2048  }
  0x25   :  { %734 = vsyncadd [#allocation3], 4294965248 }
  0x26   :  { %735 = dma.done.wait [#allocation6], 8192  }
  0x27   :  { %736 = vsyncadd [#allocation6], 4294959104  ;;  %v745_v0 = vmov 0.0   ;;  %v51_v1 = vld [vmem:[#allocation2 + $0x8] sm:$0xff]  ;;  %v50_v3 = vld [vmem:[#allocation2] sm:$0xff]  ;;  %vm88_vm0 = vcmask 261120  }
  0x28   :  { %156 = vmatprep.mubr.f32.mxu0 %v745_v0  ;;  %227 = vmatprep.mubr.f32.mxu1 %v745_v0  ;;  %v55_v2 = vld [vmem:[#allocation2 + $0x28] sm:$0xff]  ;;  %v54_v5 = vld [vmem:[#allocation2 + $0x20] sm:$0xff]  ;;  %v53_v6 = vld [vmem:[#allocation2 + $0x18] sm:$0xff] }
  0x29   :  { %v573_v4 = vpack.c.bf16 %v55_v2, %v51_v1  ;;  %v57_v7 = vld [vmem:[#allocation2 + $0x38] sm:$0xff]  ;;  %v575_v8 = vpack.c.bf16 %v54_v5, %v50_v3  ;;  %v52_v10 = vld [vmem:[#allocation2 + $0x10] sm:$0xff]  ;;  %v59_v12 = vld [vmem:[#allocation2 + $0x48] sm:$0xff] }
  0x2a   :  { %v581_v9 = vpack.c.bf16 %v57_v7, %v53_v6  ;;  %v56_v11 = vld [vmem:[#allocation2 + $0x30] sm:$0xff]  ;;  %v63_v14 = vld [vmem:[#allocation2 + $0x68] sm:$0xff]  ;;  %v58_v15 = vld [vmem:[#allocation2 + $0x40] sm:$0xff] }
  0x2b   :  { %574 = vmatprep.subr.bf16.mxu0 %v573_v4  ;;  %v583_v13 = vpack.c.bf16 %v56_v11, %v52_v10  ;;  %v62_v16 = vld [vmem:[#allocation2 + $0x60] sm:$0xff]  ;;  %v577_v17 = vpack.c.bf16 %v63_v14, %v59_v12  ;;  %v61_v19 = vld [vmem:[#allocation2 + $0x58] sm:$0xff]  ;;  %v60_v21 = vld [vmem:[#allocation2 + $0x50] sm:$0xff]  ;;  %v68_v10 = vlaneseq }
  0x2c   :  { %576 = vmatpush1.bf16.msra.mxu0 %v575_v8  ;;  %582 = vmatprep.subr.bf16.mxu1 %v581_v9  ;;  %v579_v18 = vpack.c.bf16 %v62_v16, %v58_v15  ;;  %v65_v20 = vld [vmem:[#allocation2 + $0x78] sm:$0xff]  ;;  %v64_v23 = vld [vmem:[#allocation2 + $0x70] sm:$0xff]  ;;  %v49_v25 = vld [vmem:[%s845_s0] sm:$0xff] }
  0x2d   :  { %584 = vmatpush1.bf16.msra.mxu1 %v583_v13  ;;  %v585_v22 = vpack.c.bf16 %v65_v20, %v61_v19  ;;  %578 = vmatprep.subr.bf16.mxu0 %v577_v17  ;;  %v587_v24 = vpack.c.bf16 %v64_v23, %v60_v21  ;;  %v265_v26 = vld [vmem:[#allocation5 + $0x80] sm:$0xff]  ;;  %v266_v27 = vld [vmem:[#allocation5 + $0x88] sm:$0xff]  ;;  %v267_v37 = vld [vmem:[#allocation5 + $0x90] sm:$0xff]  ;;  %v69_v11 = vshrl.u32 %v68_v10, 7 }
  0x2e   :  { %v297_v28 = vld [vmem:[#allocation5 + $0x180] sm:$0xff]  ;;  %v589_v29 = vpack.c.bf16 %v266_v27, %v265_v26  ;;  %v298_v30 = vld [vmem:[#allocation5 + $0x188] sm:$0xff]  ;;  %v268_v39 = vld [vmem:[#allocation5 + $0x98] sm:$0xff] }
  0x2f   :  { %586 = vmatprep.subr.bf16.mxu1 %v585_v22  ;;  %v249_v31 = vld [vmem:[#allocation5] sm:$0xff]  ;;  %v250_v32 = vld [vmem:[#allocation5 + $0x8] sm:$0xff]  ;;  %v621_v33 = vpack.c.bf16 %v298_v30, %v297_v28  ;;  %v299_v40 = vld [vmem:[#allocation5 + $0x190] sm:$0xff]  ;;  %v593_v42 = vpack.c.bf16 %v268_v39, %v267_v37  ;;  %v70_v12 = vsub.s32 0, %v69_v11  ;;  %v74_v14 = vsub.s32 1, %v69_v11 }
  0x30   :  { %580 = vmatpush1.bf16.msra.mxu0 %v579_v18  ;;  %v591_v34 = vpack.c.bf16 %v250_v32, %v249_v31  ;;  %v281_v35 = vld [vmem:[#allocation5 + $0x100] sm:$0xff]  ;;  %v282_v36 = vld [vmem:[#allocation5 + $0x108] sm:$0xff]  ;;  %v300_v41 = vld [vmem:[#allocation5 + $0x198] sm:$0xff]  ;;  %v78_v15 = vsub.s32 2, %v69_v11  ;;  %v82_v16 = vsub.s32 3, %v69_v11 }
  0x31   :  { %588 = vmatpush1.bf16.msra.mxu1 %v587_v24  ;;  %590 = vmatprep.subr.bf16.mxu0 %v589_v29  ;;  %v623_v38 = vpack.c.bf16 %v282_v36, %v281_v35  ;;  %v625_v43 = vpack.c.bf16 %v300_v41, %v299_v40  ;;  %v251_v44 = vld [vmem:[#allocation5 + $0x10] sm:$0xff]  ;;  %v252_v45 = vld [vmem:[#allocation5 + $0x18] sm:$0xff]  ;;  %v269_v49 = vld [vmem:[#allocation5 + $0xa0] sm:$0xff] }
  0x32   :  { %622 = vmatprep.subr.bf16.mxu1 %v621_v33  ;;  %v283_v46 = vld [vmem:[#allocation5 + $0x110] sm:$0xff]  ;;  %v595_v47 = vpack.c.bf16 %v252_v45, %v251_v44  ;;  %v284_v48 = vld [vmem:[#allocation5 + $0x118] sm:$0xff]  ;;  %v270_v50 = vld [vmem:[#allocation5 + $0xa8] sm:$0xff] }
  0x33   :  { %498 = vmatmul.mubr.msk.f32.vlgmr.msra.gmra.mrb[0].mxu0 %vm88_vm0, %v49_v25  ;;  %v627_v51 = vpack.c.bf16 %v284_v48, %v283_v46  ;;  %v597_v52 = vpack.c.bf16 %v270_v50, %v269_v49  ;;  %v301_v53 = vld [vmem:[#allocation5 + $0x1a0] sm:$0xff]  ;;  %v302_v54 = vld [vmem:[#allocation5 + $0x1a8] sm:$0xff]  ;;  %v271_v61 = vld [vmem:[#allocation5 + $0xb0] sm:$0xff] }
  0x34   :  { %499 = vmatmul.mubr.msk.f32.vlgmr.msra.gmra.mrb[0].mxu1 %vm88_vm0, %v49_v25  ;;  %592 = vmatpush3.bf16.msra.mxu0 %v591_v34  ;;  %v253_v55 = vld [vmem:[#allocation5 + $0x20] sm:$0xff]  ;;  %v629_v56 = vpack.c.bf16 %v302_v54, %v301_v53  ;;  %v254_v57 = vld [vmem:[#allocation5 + $0x28] sm:$0xff]  ;;  %v272_v62 = vld [vmem:[#allocation5 + $0xb8] sm:$0xff] }
  0x35   :  { %624 = vmatpush3.bf16.msra.mxu1 %v623_v38  ;;  %594 = vmatprep.subr.bf16.mxu0 %v593_v42  ;;  %v285_v58 = vld [vmem:[#allocation5 + $0x120] sm:$0xff]  ;;  %v286_v59 = vld [vmem:[#allocation5 + $0x128] sm:$0xff]  ;;  %v599_v60 = vpack.c.bf16 %v254_v57, %v253_v55  ;;  %v303_v63 = vld [vmem:[#allocation5 + $0x1b0] sm:$0xff]  ;;  %v601_v1 = vpack.c.bf16 %v272_v62, %v271_v61 }
  0x36   :  { %626 = vmatprep.subr.bf16.mxu1 %v625_v43  ;;  %v631_v0 = vpack.c.bf16 %v286_v59, %v285_v58  ;;  %v304_v2 = vld [vmem:[#allocation5 + $0x1b8] sm:$0xff]  ;;  %v255_v3 = vld [vmem:[#allocation5 + $0x30] sm:$0xff]  ;;  %v66_v13 = vld [vmem:[%s847_s2] sm:$0xf] }
  0x37   :  { %v256_v4 = vld [vmem:[#allocation5 + $0x38] sm:$0xff]  ;;  %v633_v5 = vpack.c.bf16 %v304_v2, %v303_v63  ;;  %v287_v6 = vld [vmem:[#allocation5 + $0x130] sm:$0xff]  ;;  %v71_v17 = vrot.slane %v66_v13, %v70_v12  ;;  %v75_v18 = vrot.slane %v66_v13, %v74_v14  ;;  %v79_v19 = vrot.slane %v66_v13, %v78_v15  ;;  %v273_v36 = vld [vmem:[#allocation5 + $0xc0] sm:$0xff] }
  0x38   :  { %596 = vmatpush3.bf16.msra.mxu0 %v595_v47  ;;  %v288_v7 = vld [vmem:[#allocation5 + $0x138] sm:$0xff]  ;;  %v603_v8 = vpack.c.bf16 %v256_v4, %v255_v3  ;;  %v83_v21 = vrot.slane %v66_v13, %v82_v16  ;;  %v274_v37 = vld [vmem:[#allocation5 + $0xc8] sm:$0xff]  ;;  %v305_v38 = vld [vmem:[#allocation5 + $0x1c0] sm:$0xff] }
  0x39   :  { %628 = vmatpush3.bf16.msra.mxu1 %v627_v51  ;;  %598 = vmatprep.subr.bf16.mxu0 %v597_v52  ;;  %v635_v9 = vpack.c.bf16 %v288_v7, %v287_v6  ;;  %v605_v39 = vpack.c.bf16 %v274_v37, %v273_v36  ;;  %v306_v40 = vld [vmem:[#allocation5 + $0x1c8] sm:$0xff]  ;;  %v257_v41 = vld [vmem:[#allocation5 + $0x40] sm:$0xff]  ;;  %v275_v48 = vld [vmem:[#allocation5 + $0xd0] sm:$0xff] }
  0x3a   :  { %630 = vmatprep.subr.bf16.mxu1 %v629_v56  ;;  %v258_v42 = vld [vmem:[#allocation5 + $0x48] sm:$0xff]  ;;  %v637_v43 = vpack.c.bf16 %v306_v40, %v305_v38  ;;  %v289_v45 = vld [vmem:[#allocation5 + $0x140] sm:$0xff]  ;;  %v276_v49 = vld [vmem:[#allocation5 + $0xd8] sm:$0xff] }
  0x3b   :  { %v607_v44 = vpack.c.bf16 %v258_v42, %v257_v41  ;;  %v290_v46 = vld [vmem:[#allocation5 + $0x148] sm:$0xff]  ;;  %v307_v50 = vld [vmem:[#allocation5 + $0x1d0] sm:$0xff]  ;;  %v609_v51 = vpack.c.bf16 %v276_v49, %v275_v48  ;;  %v308_v52 = vld [vmem:[#allocation5 + $0x1d8] sm:$0xff] }
  0x3c   :  { %600 = vmatpush3.bf16.msra.mxu0 %v599_v60  ;;  %v639_v47 = vpack.c.bf16 %v290_v46, %v289_v45  ;;  %v259_v53 = vld [vmem:[#allocation5 + $0x50] sm:$0xff]  ;;  %v260_v54 = vld [vmem:[#allocation5 + $0x58] sm:$0xff]  ;;  %v641_v55 = vpack.c.bf16 %v308_v52, %v307_v50  ;;  %v277_v59 = vld [vmem:[#allocation5 + $0xe0] sm:$0xff]  ;;  %v473_v45 = vand.u32 127, %v68_v10 }
  0x3d   :  { %632 = vmatpush3.bf16.msra.mxu1 %v631_v0  ;;  %602 = vmatprep.subr.bf16.mxu0 %v601_v1  ;;  %v611_v56 = vpack.c.bf16 %v260_v54, %v259_v53  ;;  %v291_v57 = vld [vmem:[#allocation5 + $0x150] sm:$0xff]  ;;  %v292_v58 = vld [vmem:[#allocation5 + $0x158] sm:$0xff]  ;;  %v278_v61 = vld [vmem:[#allocation5 + $0xe8] sm:$0xff] }
  0x3e   :  { %634 = vmatprep.subr.bf16.mxu1 %v633_v5  ;;  %v643_v60 = vpack.c.bf16 %v292_v58, %v291_v57  ;;  %v309_v62 = vld [vmem:[#allocation5 + $0x1e0] sm:$0xff]  ;;  %v310_v63 = vld [vmem:[#allocation5 + $0x1e8] sm:$0xff]  ;;  %v613_v0 = vpack.c.bf16 %v278_v61, %v277_v59  ;;  %v279_v7 = vld [vmem:[#allocation5 + $0xf0] sm:$0xff] }
  0x3f   :  { %v645_v1 = vpack.c.bf16 %v310_v63, %v309_v62  ;;  %v261_v2 = vld [vmem:[#allocation5 + $0x60] sm:$0xff]  ;;  %v262_v3 = vld [vmem:[#allocation5 + $0x68] sm:$0xff]  ;;  %v311_v12 = vld [vmem:[#allocation5 + $0x1f0] sm:$0xff] }
  0x40   :  { %604 = vmatpush3.bf16.msra.mxu0 %v603_v8  ;;  %v293_v4 = vld [vmem:[#allocation5 + $0x160] sm:$0xff]  ;;  %v615_v5 = vpack.c.bf16 %v262_v3, %v261_v2  ;;  %v294_v6 = vld [vmem:[#allocation5 + $0x168] sm:$0xff]  ;;  %v280_v8 = vld [vmem:[#allocation5 + $0xf8] sm:$0xff] }
  0x41   :  { %636 = vmatpush3.bf16.msra.mxu1 %v635_v9  ;;  %606 = vmatprep.subr.bf16.mxu0 %v605_v39  ;;  %v647_v9 = vpack.c.bf16 %v294_v6, %v293_v4  ;;  %v617_v11 = vpack.c.bf16 %v280_v8, %v279_v7  ;;  %v312_v13 = vld [vmem:[#allocation5 + $0x1f8] sm:$0xff]  ;;  %v263_v14 = vld [vmem:[#allocation5 + $0x70] sm:$0xff] }
  0x42   :  { %638 = vmatprep.subr.bf16.mxu1 %v637_v43  ;;  %v649_v15 = vpack.c.bf16 %v312_v13, %v311_v12  ;;  %v264_v16 = vld [vmem:[#allocation5 + $0x78] sm:$0xff] }
  0x44   :  { %608 = vmatpush3.bf16.msra.mxu0 %v607_v44 }
  0x45   :  { %640 = vmatpush3.bf16.msra.mxu1 %v639_v47  ;;  %610 = vmatprep.subr.bf16.mxu0 %v609_v51 }
  0x46   :  { %642 = vmatprep.subr.bf16.mxu1 %v641_v55 }
  0x48   :  { %612 = vmatpush3.bf16.msra.mxu0 %v611_v56 }
  0x49   :  { %644 = vmatpush3.bf16.msra.mxu1 %v643_v60  ;;  %614 = vmatprep.subr.bf16.mxu0 %v613_v0 }
  0x4a   :  { %646 = vmatprep.subr.bf16.mxu1 %v645_v1 }
  0x4c   :  { %616 = vmatpush3.bf16.msra.mxu0 %v615_v5 }
  0x4d   :  { %648 = vmatpush3.bf16.msra.mxu1 %v647_v9  ;;  %618 = vmatprep.subr.bf16.mxu0 %v617_v11 }
  0x4e   :  { %650 = vmatprep.subr.bf16.mxu1 %v649_v15 }
 0x106   :  { %v158_v20 = vpop.f32.mrb[0].mxu0 }
 0x107   :  { %v809_v22 = vadd.f32 %v158_v20, %v71_v17  ;;  %v160_v23 = vpop.f32.mrb[1].mxu0  ;;  %v229_v24 = vpop.f32.mrb[0].mxu1  ;;  %v295_v17 = vld [vmem:[#allocation5 + $0x170] sm:$0xff] }
 0x108   :  { %v811_v25 = vadd.f32 %v160_v23, %v75_v18  ;;  %v813_v26 = vadd.f32 %v229_v24, %v79_v19  ;;  %v231_v27 = vpop.f32.mrb[1].mxu1  ;;  %v296_v18 = vld [vmem:[#allocation5 + $0x178] sm:$0xff]  ;;  %v619_v19 = vpack.c.bf16 %v264_v16, %v263_v14  ;;  %v746_v23 = vmov 0  }
 0x109   :  { %v234_v28 = vmul.f32 %v809_v22, %v809_v22  ;;  %v821_v31 = vadd.f32 %v231_v27, %v83_v21  ;;  %v651_v20 = vpack.c.bf16 %v296_v18, %v295_v17  ;;  %v474_v21 = vld [vmem:[%s849_s4] sm:$0xff]  ;;  %662 = vset.pattern.permute.xlu0 %v746_v23  ;;  %s747_s4 = smov [#allocation7]  }
 0x10a   :  { %v235_v29 = vmul.f32 %v811_v25, %v811_v25  ;;  %v236_v30 = vmul.f32 %v813_v26, %v813_v26  ;;  %620 = vmatpush3.bf16.msra.mxu0 %v619_v19  ;;  %s488_s23 = sshll.u32 %s747_s4, 4  ;;  %s489_s23 = int_to_ptr.vmem [resolvable:$true] %s488_s23 }
 0x10b   :  { %v237_v33 = vmul.f32 %v821_v31, %v821_v31  ;;  %652 = vmatpush3.bf16.msra.mxu1 %v651_v20  ;;  %s711_s24 = scalar_lea.vmem %s489_s23, 128  ;;  %p716_p3 = scmp.lt.s32.totalorder %s489_s23, %s489_s23 }
 0x10c   :  { %v238_v32 = vadd.f32 %v235_v29, %v234_v28  ;;  %p712_p2 = scmp.ne.s32.totalorder %s489_s23, %s711_s24  ;;  %p717_p4 = scmp.lt.s32.totalorder %s711_s24, %s711_s24 }
 0x10e   :  { %v239_v34 = vadd.f32 %v238_v32, %v236_v30  ;;  %p718_p5 = por %p717_p4, %p716_p3 }
 0x110   :  { %v240_v35 = vadd.f32 %v239_v34, %v237_v33  ;;  %p719_p6 = pnand %p718_p5, %p712_p2 }
 0x112   :  { %241 = vadd.xlane.f32.xlu0 %v240_v35 }
 0x128   :  { %476 = vperm.xlu0 %662, %v474_v21  }
 0x19f   :  { %v242_v24 = vpop.xlane.xlu0 %241 }
 0x1a0   :  { %v243_v27 = vmax.f32 %v242_v24, 1e-24 }
 0x1a2   :  { %663 = vrsqrt.f32 %v243_v27 }
 0x1a7   :  { %v477_v48 = vpop.permute.xlu0 %476 }
 0x1a8   :  { %vm478_vm3 = vcmp.eq.s32.totalorder %v473_v45, %v477_v48 }
 0x1ac   :  { %v664_v28 = vpop.eup %663 }
 0x1ad   :  { %v246_v29 = vmul.f32 %v664_v28, %v811_v25  ;;  %v248_v30 = vmul.f32 %v664_v28, %v821_v31  ;;  %v245_v32 = vmul.f32 %v664_v28, %v809_v22  ;;  %v247_v33 = vmul.f32 %v664_v28, %v813_v26 }
 0x1af   :  { %377 = vmatprep.mubr.f32.mxu0 %v246_v29  ;;  %447 = vmatprep.mubr.f32.mxu1 %v248_v30 }
 0x1b0   :  { %378 = vmatmul.mubr.f32.vlgmr.msra.gmra.mrb[2].mxu0 %v245_v32  ;;  %448 = vmatmul.mubr.f32.vlgmr.msra.gmra.mrb[2].mxu1 %v247_v33 }
 0x283   :  { %v535_v34 = vpop.f32.mrb[2].mxu0  ;;  %v570_v35 = vpop.f32.mrb[2].mxu1 }
 0x284   :  { %v536_v36 = vpop.f32.mrb[3].mxu0  ;;  %v571_v37 = vpop.f32.mrb[3].mxu1 }
 0x285   :  { %v537_v38 = vadd.f32 %v536_v36, %v535_v34  ;;  %v572_v39 = vadd.f32 %v571_v37, %v570_v35 }
 0x287   :  { %v450_v40 = vadd.f32 %v572_v39, %v537_v38 }
 0x289   :  { %v500_v41 = vclamps-f32 %v450_v40, 1.0 }
 0x28b   :  { %v455_v42 = vmul.f32 %v500_v41, %v500_v41  ;;  %v501_v47 = vadd.f32 0.87758255, %v500_v41  ;;  %v465_v49 = vmul.f32 0.87758255, %v500_v41  ;;  %v502_v52 = vadd.f32 -0.23971277, %v500_v41 }
 0x28d   :  { %v456_v25 = vsub.f32 1.0, %v455_v42  ;;  %vm469_vm4 = vcmp.le.f32.partialorder %v501_v47, 0.0 }
 0x28f   :  { %v457_v43 = vmax.f32 %v456_v25, 0.0 }
 0x291   :  { %665 = vrsqrt.f32 %v457_v43  ;;  %vm460_vm1 = vcmp.eq.f32.partialorder %v457_v43, inf  ;;  %v463_v26 = vand.u32 2147483648, %v457_v43  ;;  %vm462_vm2 = vcmp.eq.f32.partialorder %v457_v43, 0.0 }
 0x29b   :  { %v666_v31 = vpop.eup %665 }
 0x29c   :  { %v459_v22 = vmul.f32 %v666_v31, %v457_v43 }
 0x29e   :  { %v461_v44 = vsel %vm460_vm1, %v457_v43, %v459_v22 }
 0x29f   :  { %v464_v46 = vsel %vm462_vm2, %v463_v26, %v461_v44 }
 0x2a0   :  { %v466_v50 = vmul.f32 0.47942555, %v464_v46 }
 0x2a2   :  { %v467_v51 = vsub.f32 %v465_v49, %v466_v50 }
 0x2a4   :  { %v471_v53 = vsel %vm469_vm4, %v502_v52, %v467_v51 }
 0x2a5   :  { %v479_v54 = vsel %vm478_vm3, %v471_v53, %v500_v41 }
 0x2a6   :  { %v480_v55 = vmul.f32 32.0, %v479_v54 }
 0x2a8   :  { %481 = vst [vmem:[#allocation7] sm:$0xff] %v480_v55 }
 0x2a9   :  { %722 = shalt.err (!%p719_p6)
}
 0x2aa   :  { %s723_s27 = scalar_lea.hbm %s850_s5, 128 }
 0x2ab   :  { %p724_p7 = scmp.ne.s32.totalorder %s850_s5, %s723_s27  ;;  %p727_p8 = scmp.lt.u32.totalorder %s723_s27, %s850_s5 }
 0x2ad   :  { %p729_p9 = pnand %p727_p8, %p724_p7 }
 0x2af   :  { %732 = shalt.err (!%p729_p9)
}
 0x2b0   :  { %491 = dma.vmem_to_hbm [thread:$0]  %s489_s23, 128, %s850_s5, [#allocation4]  }
 0x2b1   :  { %737 = dma.done.wait [#allocation4], 128  }
 0x2b2   :  { %738 = vsyncadd [#allocation4], 4294967168 }
 0x2b3   :  { %495 = vsyncpa [#allocation3], 1 }
 0x2b4   :  { %496 = vsyncpa [#allocation6], 1 }
 0x2b5   :  { %497 = vsyncpa [#allocation4], 1 }

</bundles_post_ra>
